<compile_context>
chip_gen: v7x
topology: tpu7x:2x2x1
jax: 0.10.0
libtpu: 0.0.40
codegen_flags: <defaults>
</compile_context>

<pallas_src>
import jax
import jax.numpy as jnp
import numpy as np
from jax import lax
from jax.experimental import pallas as pl
from jax.experimental.pallas import tpu as pltpu

INPUT_SIZE = 28
HIDDEN = 64
NUM_CLASSES = 10
OUT_PAD = 128   # lane-dense classifier tile; sliced back to NUM_CLASSES in the wrapper


def lstm_classifier_kernel(x_ref, w_ih_ref, w_hh_ref, b_ref,
                           w_out_ref, b_out_ref, out_ref, xw_ref):
    """LSTM over the full sequence + final Linear on h_T, for one batch block.

    x_ref     : (T, Bb, I)    f32  time-major input block
    w_ih_ref  : (I, 4H)       f32  gate order [i, f, o, g]
    w_hh_ref  : (H, 4H)       f32  gate order [i, f, o, g]
    b_ref     : (1, 4H)       f32  bias_ih + bias_hh, gate order [i, f, o, g]
    w_out_ref : (H, OUT_PAD)  f32  zero-padded classifier weight
    b_out_ref : (1, OUT_PAD)  f32  zero-padded classifier bias
    out_ref   : (Bb, OUT_PAD) f32
    xw_ref    : (T, Bb, 4H)   f32  VMEM scratch: precomputed input projection
    """
    T, Bb, I = x_ref.shape
    H = w_hh_ref.shape[0]
    G = 4 * H

    # (1) Hoisted input projection: one big matmul + a single bias broadcast,
    #     off the serialized recurrent critical path. Bb is a multiple of 8 so
    #     both reshapes below are layout-preserving.
    x2d = x_ref[...].reshape(T * Bb, I)
    pre = (jnp.dot(x2d, w_ih_ref[...], preferred_element_type=jnp.float32)
           + b_ref[...])                                   # (T*Bb, 4H)
    xw_ref[...] = pre.reshape(T, Bb, G)

    w_hh = w_hh_ref[...]        # keep the recurrent weight resident across steps

    def step(t, carry):
        h, c = carry
        gates = xw_ref[t] + jnp.dot(h, w_hh, preferred_element_type=jnp.float32)
        # Gate layout [i, f, o, g]: one contiguous 3H sigmoid slab + one H tanh slab.
        sig = jax.nn.sigmoid(gates[:, :3 * H])
        g = jnp.tanh(gates[:, 3 * H:])
        i = sig[:, 0:H]
        f = sig[:, H:2 * H]
        o = sig[:, 2 * H:3 * H]
        c_new = f * c + i * g
        h_new = o * jnp.tanh(c_new)
        return h_new, c_new

    h0 = jnp.zeros((Bb, H), jnp.float32)
    c0 = jnp.zeros((Bb, H), jnp.float32)
    # T is static and small: fully unroll so MXU/EUP/VPU work from adjacent
    # steps can interleave instead of stalling on loop-carried control.
    h_T, _ = lax.fori_loop(0, T, step, (h0, c0), unroll=True)

    # Lane-dense classifier output (padded to OUT_PAD lanes -> unmasked stores).
    out_ref[...] = (jnp.dot(h_T, w_out_ref[...], preferred_element_type=jnp.float32)
                    + b_out_ref[...])


def rnn_forward(x, params):
    """x: (B, T, INPUT_SIZE) float32, batch_first like the PyTorch module."""
    B, T, I = x.shape
    H = HIDDEN
    w_ih, w_hh, b_ih, b_hh, w_out, b_out = params

    # Reorder PyTorch's gate layout [i, f, g, o] -> [i, f, o, g] (sigmoid gates
    # contiguous) and transpose weights to (in_features, out_features).
    def reorder(w):
        return jnp.concatenate([w[:2 * H], w[3 * H:4 * H], w[2 * H:3 * H]], axis=0)

    w_ih_t = reorder(w_ih).T                          # (I, 4H)
    w_hh_t = reorder(w_hh).T                          # (H, 4H)
    b = reorder(b_ih + b_hh)[None, :]                 # (1, 4H)

    # Lane-dense classifier: pad 10 -> OUT_PAD output lanes (sliced off below).
    w_out_p = jnp.zeros((H, OUT_PAD), jnp.float32).at[:, :NUM_CLASSES].set(w_out.T)
    b_out_p = jnp.zeros((1, OUT_PAD), jnp.float32).at[0, :NUM_CLASSES].set(b_out)

    # Pad batch to a sublane-aligned block size and block it over a parallel
    # grid axis (lets v7x's two TensorCores split the batch).
    B_pad8 = ((B + 7) // 8) * 8
    B_BLK = min(B_pad8, 512)
    B_pad = ((B_pad8 + B_BLK - 1) // B_BLK) * B_BLK
    n_blocks = B_pad // B_BLK

    # Time-major layout keeps the in-kernel per-step read xw_ref[t] contiguous
    # and the in-kernel reshapes layout-preserving. The heavy lifting (the
    # input projection) is done inside the kernel in a single matmul.
    x_tm = jnp.transpose(x, (1, 0, 2)).astype(jnp.float32)       # (T, B, I)
    if B_pad != B:
        x_tm = jnp.pad(x_tm, ((0, 0), (0, B_pad - B), (0, 0)))

    out = pl.pallas_call(
        lstm_classifier_kernel,
        out_shape=jax.ShapeDtypeStruct((B_pad, OUT_PAD), jnp.float32),
        grid=(n_blocks,),
        in_specs=[
            pl.BlockSpec((T, B_BLK, I), lambda bi: (0, bi, 0)),
            pl.BlockSpec((I, 4 * H), lambda bi: (0, 0)),
            pl.BlockSpec((H, 4 * H), lambda bi: (0, 0)),
            pl.BlockSpec((1, 4 * H), lambda bi: (0, 0)),
            pl.BlockSpec((H, OUT_PAD), lambda bi: (0, 0)),
            pl.BlockSpec((1, OUT_PAD), lambda bi: (0, 0)),
        ],
        out_specs=pl.BlockSpec((B_BLK, OUT_PAD), lambda bi: (bi, 0)),
        scratch_shapes=[pltpu.VMEM((T, B_BLK, 4 * H), jnp.float32)],
        compiler_params=pltpu.CompilerParams(
            dimension_semantics=("parallel",)),
    )(x_tm, w_ih_t, w_hh_t, b, w_out_p, b_out_p)

    return out[:B, :NUM_CLASSES]


def init_params(key):
    """Deterministic init matching the PyTorch module's parameter shapes."""
    ks = jax.random.split(key, 6)
    bound_lstm = 1.0 / np.sqrt(HIDDEN)
    bound_lin = 1.0 / np.sqrt(HIDDEN)
    w_ih = jax.random.uniform(ks[0], (4 * HIDDEN, INPUT_SIZE), jnp.float32,
                              -bound_lstm, bound_lstm)
    w_hh = jax.random.uniform(ks[1], (4 * HIDDEN, HIDDEN), jnp.float32,
                              -bound_lstm, bound_lstm)
    b_ih = jax.random.uniform(ks[2], (4 * HIDDEN,), jnp.float32,
                              -bound_lstm, bound_lstm)
    b_hh = jax.random.uniform(ks[3], (4 * HIDDEN,), jnp.float32,
                              -bound_lstm, bound_lstm)
    w_out = jax.random.uniform(ks[4], (NUM_CLASSES, HIDDEN), jnp.float32,
                               -bound_lin, bound_lin)
    b_out = jax.random.uniform(ks[5], (NUM_CLASSES,), jnp.float32,
                               -bound_lin, bound_lin)
    return (w_ih, w_hh, b_ih, b_hh, w_out, b_out)


def rnn_forward_ref(x, params):
    """Pure-JAX reference with PyTorch LSTM semantics (for validation)."""
    w_ih, w_hh, b_ih, b_hh, w_out, b_out = params
    B, T, I = x.shape
    H = HIDDEN

    def step(carry, x_t):
        h, c = carry
        gates = x_t @ w_ih.T + b_ih + h @ w_hh.T + b_hh
        i = jax.nn.sigmoid(gates[:, 0:H])
        f = jax.nn.sigmoid(gates[:, H:2 * H])
        g = jnp.tanh(gates[:, 2 * H:3 * H])
        o = jax.nn.sigmoid(gates[:, 3 * H:4 * H])
        c_new = f * c + i * g
        h_new = o * jnp.tanh(c_new)
        return (h_new, c_new), None

    h0 = jnp.zeros((B, H), jnp.float32)
    c0 = jnp.zeros((B, H), jnp.float32)
    (h_T, _), _ = lax.scan(step, (h0, c0), jnp.transpose(x, (1, 0, 2)))
    return h_T @ w_out.T + b_out


if __name__ == "__main__":
    key = jax.random.PRNGKey(0)
    k_param, k_x = jax.random.split(key)
    params = init_params(k_param)

    B, T = 2, 8
    x = jax.random.normal(k_x, (B, T, INPUT_SIZE), jnp.float32)

    out = jax.block_until_ready(rnn_forward(x, params))
    ref = jax.block_until_ready(rnn_forward_ref(x, params))

    assert out.shape == (B, NUM_CLASSES)
    np.testing.assert_allclose(np.asarray(out), np.asarray(ref), rtol=1e-5, atol=1e-5)
    print("KERNEL_OK")
</pallas_src>

<mosaic_0001>
module attributes {stable_mosaic.version = 11 : i64} {
  func.func @lstm_classifier_kernel(%arg0: i32, %arg1: memref<8x8x28xf32, #tpu.memory_space<vmem>>, %arg2: memref<28x256xf32, #tpu.memory_space<vmem>>, %arg3: memref<64x256xf32, #tpu.memory_space<vmem>>, %arg4: memref<1x256xf32, #tpu.memory_space<vmem>>, %arg5: memref<64x128xf32, #tpu.memory_space<vmem>>, %arg6: memref<1x128xf32, #tpu.memory_space<vmem>>, %arg7: memref<8x128xf32, #tpu.memory_space<vmem>>, %arg8: memref<8x8x256xf32, #tpu.memory_space<vmem>>) attributes {dimension_semantics = [#tpu.dimension_semantics<parallel>], iteration_bounds = array<i64: 1>, scalar_prefetch = 0 : i64, scratch_operands = 1 : i64, tpu.core_type = #tpu.core_type<tc>, window_params = [{transform_indices = @transform_0, window_bounds = array<i64: 8, 8, 28>}, {pipeline_mode = #tpu.pipeline_mode<synchronous>, transform_indices = @transform_1, window_bounds = array<i64: 28, 256>}, {pipeline_mode = #tpu.pipeline_mode<synchronous>, transform_indices = @transform_2, window_bounds = array<i64: 64, 256>}, {pipeline_mode = #tpu.pipeline_mode<synchronous>, transform_indices = @transform_3, window_bounds = array<i64: 1, 256>}, {pipeline_mode = #tpu.pipeline_mode<synchronous>, transform_indices = @transform_4, window_bounds = array<i64: 64, 128>}, {pipeline_mode = #tpu.pipeline_mode<synchronous>, transform_indices = @transform_5, window_bounds = array<i64: 1, 128>}, {transform_indices = @transform_6, window_bounds = array<i64: 8, 128>}]} {
    %c0 = arith.constant 0 : index
    %c0_0 = arith.constant 0 : index
    %c0_1 = arith.constant 0 : index
    %0 = vector.load %arg1[%c0, %c0_0, %c0_1] : memref<8x8x28xf32, #tpu.memory_space<vmem>>, vector<8x8x28xf32>
    %1 = vector.shape_cast %0 : vector<8x8x28xf32> to vector<64x28xf32>
    %c0_2 = arith.constant 0 : index
    %c0_3 = arith.constant 0 : index
    %2 = vector.load %arg2[%c0_2, %c0_3] : memref<28x256xf32, #tpu.memory_space<vmem>>, vector<28x256xf32>
    %cst = arith.constant dense<0.000000e+00> : vector<64x256xf32>
    %3 = tpu.matmul %1, %2, %cst {dimension_numbers = #tpu.dot_dimension_numbers<[1], [0], [0], [1], [0, 0, 1, 1], [], []>} : vector<64x28xf32>, vector<28x256xf32>, vector<64x256xf32> -> vector<64x256xf32>
    %c0_4 = arith.constant 0 : index
    %c0_5 = arith.constant 0 : index
    %4 = vector.load %arg4[%c0_4, %c0_5] : memref<1x256xf32, #tpu.memory_space<vmem>>, vector<1x256xf32>
    %5 = vector.broadcast %4 : vector<1x256xf32> to vector<64x256xf32>
    %6 = arith.addf %3, %5 : vector<64x256xf32>
    %7 = vector.shape_cast %6 : vector<64x256xf32> to vector<8x8x256xf32>
    %c0_6 = arith.constant 0 : index
    %c0_7 = arith.constant 0 : index
    %c0_8 = arith.constant 0 : index
    %8 = vector.load %arg8[%c0_6, %c0_7, %c0_8] : memref<8x8x256xf32, #tpu.memory_space<vmem>>, vector<8x8x256xf32>
    tpu.vector_store %arg8[%c0_6, %c0_7, %c0_8], %7 {strides = array<i32>} : memref<8x8x256xf32, #tpu.memory_space<vmem>>, vector<8x8x256xf32>,
    %c0_9 = arith.constant 0 : index
    %c0_10 = arith.constant 0 : index
    %9 = vector.load %arg3[%c0_9, %c0_10] : memref<64x256xf32, #tpu.memory_space<vmem>>, vector<64x256xf32>
    %cst_11 = arith.constant 0.000000e+00 : f32
    %10 = vector.broadcast %cst_11 : f32 to vector<8x64xf32>
    %cst_12 = arith.constant 0.000000e+00 : f32
    %11 = vector.broadcast %cst_12 : f32 to vector<8x64xf32>
    %c0_i32 = arith.constant 0 : i32
    %12 = arith.index_cast %c0_i32 : i32 to index
    %c0_13 = arith.constant 0 : index
    %c0_14 = arith.constant 0 : index
    %13 = vector.load %arg8[%12, %c0_13, %c0_14] : memref<8x8x256xf32, #tpu.memory_space<vmem>>, vector<1x8x256xf32>
    %14 = vector.shape_cast %13 : vector<1x8x256xf32> to vector<8x256xf32>
    %cst_15 = arith.constant dense<0.000000e+00> : vector<8x256xf32>
    %15 = tpu.matmul %10, %9, %cst_15 {dimension_numbers = #tpu.dot_dimension_numbers<[1], [0], [0], [1], [0, 0, 1, 1], [], []>} : vector<8x64xf32>, vector<64x256xf32>, vector<8x256xf32> -> vector<8x256xf32>
    %16 = arith.addf %14, %15 : vector<8x256xf32>
    %17 = vector.extract_strided_slice %16 {offsets = [0, 0], sizes = [8, 192], strides = [1, 1]} : vector<8x256xf32> to vector<8x192xf32>
    %18 = arith.negf %17 : vector<8x192xf32>
    %19 = math.exp %18 : vector<8x192xf32>
    %cst_16 = arith.constant 1.000000e+00 : f32
    %20 = vector.broadcast %cst_16 : f32 to vector<8x192xf32>
    %21 = arith.addf %20, %19 : vector<8x192xf32>
    %22 = arith.divf %20, %21 : vector<8x192xf32>
    %23 = vector.extract_strided_slice %16 {offsets = [0, 192], sizes = [8, 64], strides = [1, 1]} : vector<8x256xf32> to vector<8x64xf32>
    %24 = math.tanh %23 : vector<8x64xf32>
    %25 = vector.extract_strided_slice %22 {offsets = [0, 0], sizes = [8, 64], strides = [1, 1]} : vector<8x192xf32> to vector<8x64xf32>
    %26 = vector.extract_strided_slice %22 {offsets = [0, 64], sizes = [8, 64], strides = [1, 1]} : vector<8x192xf32> to vector<8x64xf32>
    %27 = vector.extract_strided_slice %22 {offsets = [0, 128], sizes = [8, 64], strides = [1, 1]} : vector<8x192xf32> to vector<8x64xf32>
    %28 = arith.mulf %26, %11 : vector<8x64xf32>
    %29 = arith.mulf %25, %24 : vector<8x64xf32>
    %30 = arith.addf %28, %29 : vector<8x64xf32>
    %31 = math.tanh %30 : vector<8x64xf32>
    %32 = arith.mulf %27, %31 : vector<8x64xf32>
    %c1_i32 = arith.constant 1 : i32
    %33 = arith.index_cast %c1_i32 : i32 to index
    %c0_17 = arith.constant 0 : index
    %c0_18 = arith.constant 0 : index
    %34 = vector.load %arg8[%33, %c0_17, %c0_18] : memref<8x8x256xf32, #tpu.memory_space<vmem>>, vector<1x8x256xf32>
    %35 = vector.shape_cast %34 : vector<1x8x256xf32> to vector<8x256xf32>
    %cst_19 = arith.constant dense<0.000000e+00> : vector<8x256xf32>
    %36 = tpu.matmul %32, %9, %cst_19 {dimension_numbers = #tpu.dot_dimension_numbers<[1], [0], [0], [1], [0, 0, 1, 1], [], []>} : vector<8x64xf32>, vector<64x256xf32>, vector<8x256xf32> -> vector<8x256xf32>
    %37 = arith.addf %35, %36 : vector<8x256xf32>
    %38 = vector.extract_strided_slice %37 {offsets = [0, 0], sizes = [8, 192], strides = [1, 1]} : vector<8x256xf32> to vector<8x192xf32>
    %39 = arith.negf %38 : vector<8x192xf32>
    %40 = math.exp %39 : vector<8x192xf32>
    %cst_20 = arith.constant 1.000000e+00 : f32
    %41 = vector.broadcast %cst_20 : f32 to vector<8x192xf32>
    %42 = arith.addf %41, %40 : vector<8x192xf32>
    %43 = arith.divf %41, %42 : vector<8x192xf32>
    %44 = vector.extract_strided_slice %37 {offsets = [0, 192], sizes = [8, 64], strides = [1, 1]} : vector<8x256xf32> to vector<8x64xf32>
    %45 = math.tanh %44 : vector<8x64xf32>
    %46 = vector.extract_strided_slice %43 {offsets = [0, 0], sizes = [8, 64], strides = [1, 1]} : vector<8x192xf32> to vector<8x64xf32>
    %47 = vector.extract_strided_slice %43 {offsets = [0, 64], sizes = [8, 64], strides = [1, 1]} : vector<8x192xf32> to vector<8x64xf32>
    %48 = vector.extract_strided_slice %43 {offsets = [0, 128], sizes = [8, 64], strides = [1, 1]} : vector<8x192xf32> to vector<8x64xf32>
    %49 = arith.mulf %47, %30 : vector<8x64xf32>
    %50 = arith.mulf %46, %45 : vector<8x64xf32>
    %51 = arith.addf %49, %50 : vector<8x64xf32>
    %52 = math.tanh %51 : vector<8x64xf32>
    %53 = arith.mulf %48, %52 : vector<8x64xf32>
    %c2_i32 = arith.constant 2 : i32
    %54 = arith.index_cast %c2_i32 : i32 to index
    %c0_21 = arith.constant 0 : index
    %c0_22 = arith.constant 0 : index
    %55 = vector.load %arg8[%54, %c0_21, %c0_22] : memref<8x8x256xf32, #tpu.memory_space<vmem>>, vector<1x8x256xf32>
    %56 = vector.shape_cast %55 : vector<1x8x256xf32> to vector<8x256xf32>
    %cst_23 = arith.constant dense<0.000000e+00> : vector<8x256xf32>
    %57 = tpu.matmul %53, %9, %cst_23 {dimension_numbers = #tpu.dot_dimension_numbers<[1], [0], [0], [1], [0, 0, 1, 1], [], []>} : vector<8x64xf32>, vector<64x256xf32>, vector<8x256xf32> -> vector<8x256xf32>
    %58 = arith.addf %56, %57 : vector<8x256xf32>
    %59 = vector.extract_strided_slice %58 {offsets = [0, 0], sizes = [8, 192], strides = [1, 1]} : vector<8x256xf32> to vector<8x192xf32>
    %60 = arith.negf %59 : vector<8x192xf32>
    %61 = math.exp %60 : vector<8x192xf32>
    %cst_24 = arith.constant 1.000000e+00 : f32
    %62 = vector.broadcast %cst_24 : f32 to vector<8x192xf32>
    %63 = arith.addf %62, %61 : vector<8x192xf32>
    %64 = arith.divf %62, %63 : vector<8x192xf32>
    %65 = vector.extract_strided_slice %58 {offsets = [0, 192], sizes = [8, 64], strides = [1, 1]} : vector<8x256xf32> to vector<8x64xf32>
    %66 = math.tanh %65 : vector<8x64xf32>
    %67 = vector.extract_strided_slice %64 {offsets = [0, 0], sizes = [8, 64], strides = [1, 1]} : vector<8x192xf32> to vector<8x64xf32>
    %68 = vector.extract_strided_slice %64 {offsets = [0, 64], sizes = [8, 64], strides = [1, 1]} : vector<8x192xf32> to vector<8x64xf32>
    %69 = vector.extract_strided_slice %64 {offsets = [0, 128], sizes = [8, 64], strides = [1, 1]} : vector<8x192xf32> to vector<8x64xf32>
    %70 = arith.mulf %68, %51 : vector<8x64xf32>
    %71 = arith.mulf %67, %66 : vector<8x64xf32>
    %72 = arith.addf %70, %71 : vector<8x64xf32>
    %73 = math.tanh %72 : vector<8x64xf32>
    %74 = arith.mulf %69, %73 : vector<8x64xf32>
    %c3_i32 = arith.constant 3 : i32
    %75 = arith.index_cast %c3_i32 : i32 to index
    %c0_25 = arith.constant 0 : index
    %c0_26 = arith.constant 0 : index
    %76 = vector.load %arg8[%75, %c0_25, %c0_26] : memref<8x8x256xf32, #tpu.memory_space<vmem>>, vector<1x8x256xf32>
    %77 = vector.shape_cast %76 : vector<1x8x256xf32> to vector<8x256xf32>
    %cst_27 = arith.constant dense<0.000000e+00> : vector<8x256xf32>
    %78 = tpu.matmul %74, %9, %cst_27 {dimension_numbers = #tpu.dot_dimension_numbers<[1], [0], [0], [1], [0, 0, 1, 1], [], []>} : vector<8x64xf32>, vector<64x256xf32>, vector<8x256xf32> -> vector<8x256xf32>
    %79 = arith.addf %77, %78 : vector<8x256xf32>
    %80 = vector.extract_strided_slice %79 {offsets = [0, 0], sizes = [8, 192], strides = [1, 1]} : vector<8x256xf32> to vector<8x192xf32>
    %81 = arith.negf %80 : vector<8x192xf32>
    %82 = math.exp %81 : vector<8x192xf32>
    %cst_28 = arith.constant 1.000000e+00 : f32
    %83 = vector.broadcast %cst_28 : f32 to vector<8x192xf32>
    %84 = arith.addf %83, %82 : vector<8x192xf32>
    %85 = arith.divf %83, %84 : vector<8x192xf32>
    %86 = vector.extract_strided_slice %79 {offsets = [0, 192], sizes = [8, 64], strides = [1, 1]} : vector<8x256xf32> to vector<8x64xf32>
    %87 = math.tanh %86 : vector<8x64xf32>
    %88 = vector.extract_strided_slice %85 {offsets = [0, 0], sizes = [8, 64], strides = [1, 1]} : vector<8x192xf32> to vector<8x64xf32>
    %89 = vector.extract_strided_slice %85 {offsets = [0, 64], sizes = [8, 64], strides = [1, 1]} : vector<8x192xf32> to vector<8x64xf32>
    %90 = vector.extract_strided_slice %85 {offsets = [0, 128], sizes = [8, 64], strides = [1, 1]} : vector<8x192xf32> to vector<8x64xf32>
    %91 = arith.mulf %89, %72 : vector<8x64xf32>
    %92 = arith.mulf %88, %87 : vector<8x64xf32>
    %93 = arith.addf %91, %92 : vector<8x64xf32>
    %94 = math.tanh %93 : vector<8x64xf32>
    %95 = arith.mulf %90, %94 : vector<8x64xf32>
    %c4_i32 = arith.constant 4 : i32
    %96 = arith.index_cast %c4_i32 : i32 to index
    %c0_29 = arith.constant 0 : index
    %c0_30 = arith.constant 0 : index
    %97 = vector.load %arg8[%96, %c0_29, %c0_30] : memref<8x8x256xf32, #tpu.memory_space<vmem>>, vector<1x8x256xf32>
    %98 = vector.shape_cast %97 : vector<1x8x256xf32> to vector<8x256xf32>
    %cst_31 = arith.constant dense<0.000000e+00> : vector<8x256xf32>
    %99 = tpu.matmul %95, %9, %cst_31 {dimension_numbers = #tpu.dot_dimension_numbers<[1], [0], [0], [1], [0, 0, 1, 1], [], []>} : vector<8x64xf32>, vector<64x256xf32>, vector<8x256xf32> -> vector<8x256xf32>
    %100 = arith.addf %98, %99 : vector<8x256xf32>
    %101 = vector.extract_strided_slice %100 {offsets = [0, 0], sizes = [8, 192], strides = [1, 1]} : vector<8x256xf32> to vector<8x192xf32>
    %102 = arith.negf %101 : vector<8x192xf32>
    %103 = math.exp %102 : vector<8x192xf32>
    %cst_32 = arith.constant 1.000000e+00 : f32
    %104 = vector.broadcast %cst_32 : f32 to vector<8x192xf32>
    %105 = arith.addf %104, %103 : vector<8x192xf32>
    %106 = arith.divf %104, %105 : vector<8x192xf32>
    %107 = vector.extract_strided_slice %100 {offsets = [0, 192], sizes = [8, 64], strides = [1, 1]} : vector<8x256xf32> to vector<8x64xf32>
    %108 = math.tanh %107 : vector<8x64xf32>
    %109 = vector.extract_strided_slice %106 {offsets = [0, 0], sizes = [8, 64], strides = [1, 1]} : vector<8x192xf32> to vector<8x64xf32>
    %110 = vector.extract_strided_slice %106 {offsets = [0, 64], sizes = [8, 64], strides = [1, 1]} : vector<8x192xf32> to vector<8x64xf32>
    %111 = vector.extract_strided_slice %106 {offsets = [0, 128], sizes = [8, 64], strides = [1, 1]} : vector<8x192xf32> to vector<8x64xf32>
    %112 = arith.mulf %110, %93 : vector<8x64xf32>
    %113 = arith.mulf %109, %108 : vector<8x64xf32>
    %114 = arith.addf %112, %113 : vector<8x64xf32>
    %115 = math.tanh %114 : vector<8x64xf32>
    %116 = arith.mulf %111, %115 : vector<8x64xf32>
    %c5_i32 = arith.constant 5 : i32
    %117 = arith.index_cast %c5_i32 : i32 to index
    %c0_33 = arith.constant 0 : index
    %c0_34 = arith.constant 0 : index
    %118 = vector.load %arg8[%117, %c0_33, %c0_34] : memref<8x8x256xf32, #tpu.memory_space<vmem>>, vector<1x8x256xf32>
    %119 = vector.shape_cast %118 : vector<1x8x256xf32> to vector<8x256xf32>
    %cst_35 = arith.constant dense<0.000000e+00> : vector<8x256xf32>
    %120 = tpu.matmul %116, %9, %cst_35 {dimension_numbers = #tpu.dot_dimension_numbers<[1], [0], [0], [1], [0, 0, 1, 1], [], []>} : vector<8x64xf32>, vector<64x256xf32>, vector<8x256xf32> -> vector<8x256xf32>
    %121 = arith.addf %119, %120 : vector<8x256xf32>
    %122 = vector.extract_strided_slice %121 {offsets = [0, 0], sizes = [8, 192], strides = [1, 1]} : vector<8x256xf32> to vector<8x192xf32>
    %123 = arith.negf %122 : vector<8x192xf32>
    %124 = math.exp %123 : vector<8x192xf32>
    %cst_36 = arith.constant 1.000000e+00 : f32
    %125 = vector.broadcast %cst_36 : f32 to vector<8x192xf32>
    %126 = arith.addf %125, %124 : vector<8x192xf32>
    %127 = arith.divf %125, %126 : vector<8x192xf32>
    %128 = vector.extract_strided_slice %121 {offsets = [0, 192], sizes = [8, 64], strides = [1, 1]} : vector<8x256xf32> to vector<8x64xf32>
    %129 = math.tanh %128 : vector<8x64xf32>
    %130 = vector.extract_strided_slice %127 {offsets = [0, 0], sizes = [8, 64], strides = [1, 1]} : vector<8x192xf32> to vector<8x64xf32>
    %131 = vector.extract_strided_slice %127 {offsets = [0, 64], sizes = [8, 64], strides = [1, 1]} : vector<8x192xf32> to vector<8x64xf32>
    %132 = vector.extract_strided_slice %127 {offsets = [0, 128], sizes = [8, 64], strides = [1, 1]} : vector<8x192xf32> to vector<8x64xf32>
    %133 = arith.mulf %131, %114 : vector<8x64xf32>
    %134 = arith.mulf %130, %129 : vector<8x64xf32>
    %135 = arith.addf %133, %134 : vector<8x64xf32>
    %136 = math.tanh %135 : vector<8x64xf32>
    %137 = arith.mulf %132, %136 : vector<8x64xf32>
    %c6_i32 = arith.constant 6 : i32
    %138 = arith.index_cast %c6_i32 : i32 to index
    %c0_37 = arith.constant 0 : index
    %c0_38 = arith.constant 0 : index
    %139 = vector.load %arg8[%138, %c0_37, %c0_38] : memref<8x8x256xf32, #tpu.memory_space<vmem>>, vector<1x8x256xf32>
    %140 = vector.shape_cast %139 : vector<1x8x256xf32> to vector<8x256xf32>
    %cst_39 = arith.constant dense<0.000000e+00> : vector<8x256xf32>
    %141 = tpu.matmul %137, %9, %cst_39 {dimension_numbers = #tpu.dot_dimension_numbers<[1], [0], [0], [1], [0, 0, 1, 1], [], []>} : vector<8x64xf32>, vector<64x256xf32>, vector<8x256xf32> -> vector<8x256xf32>
    %142 = arith.addf %140, %141 : vector<8x256xf32>
    %143 = vector.extract_strided_slice %142 {offsets = [0, 0], sizes = [8, 192], strides = [1, 1]} : vector<8x256xf32> to vector<8x192xf32>
    %144 = arith.negf %143 : vector<8x192xf32>
    %145 = math.exp %144 : vector<8x192xf32>
    %cst_40 = arith.constant 1.000000e+00 : f32
    %146 = vector.broadcast %cst_40 : f32 to vector<8x192xf32>
    %147 = arith.addf %146, %145 : vector<8x192xf32>
    %148 = arith.divf %146, %147 : vector<8x192xf32>
    %149 = vector.extract_strided_slice %142 {offsets = [0, 192], sizes = [8, 64], strides = [1, 1]} : vector<8x256xf32> to vector<8x64xf32>
    %150 = math.tanh %149 : vector<8x64xf32>
    %151 = vector.extract_strided_slice %148 {offsets = [0, 0], sizes = [8, 64], strides = [1, 1]} : vector<8x192xf32> to vector<8x64xf32>
    %152 = vector.extract_strided_slice %148 {offsets = [0, 64], sizes = [8, 64], strides = [1, 1]} : vector<8x192xf32> to vector<8x64xf32>
    %153 = vector.extract_strided_slice %148 {offsets = [0, 128], sizes = [8, 64], strides = [1, 1]} : vector<8x192xf32> to vector<8x64xf32>
    %154 = arith.mulf %152, %135 : vector<8x64xf32>
    %155 = arith.mulf %151, %150 : vector<8x64xf32>
    %156 = arith.addf %154, %155 : vector<8x64xf32>
    %157 = math.tanh %156 : vector<8x64xf32>
    %158 = arith.mulf %153, %157 : vector<8x64xf32>
    %c7_i32 = arith.constant 7 : i32
    %159 = arith.index_cast %c7_i32 : i32 to index
    %c0_41 = arith.constant 0 : index
    %c0_42 = arith.constant 0 : index
    %160 = vector.load %arg8[%159, %c0_41, %c0_42] : memref<8x8x256xf32, #tpu.memory_space<vmem>>, vector<1x8x256xf32>
    %161 = vector.shape_cast %160 : vector<1x8x256xf32> to vector<8x256xf32>
    %cst_43 = arith.constant dense<0.000000e+00> : vector<8x256xf32>
    %162 = tpu.matmul %158, %9, %cst_43 {dimension_numbers = #tpu.dot_dimension_numbers<[1], [0], [0], [1], [0, 0, 1, 1], [], []>} : vector<8x64xf32>, vector<64x256xf32>, vector<8x256xf32> -> vector<8x256xf32>
    %163 = arith.addf %161, %162 : vector<8x256xf32>
    %164 = vector.extract_strided_slice %163 {offsets = [0, 0], sizes = [8, 192], strides = [1, 1]} : vector<8x256xf32> to vector<8x192xf32>
    %165 = arith.negf %164 : vector<8x192xf32>
    %166 = math.exp %165 : vector<8x192xf32>
    %cst_44 = arith.constant 1.000000e+00 : f32
    %167 = vector.broadcast %cst_44 : f32 to vector<8x192xf32>
    %168 = arith.addf %167, %166 : vector<8x192xf32>
    %169 = arith.divf %167, %168 : vector<8x192xf32>
    %170 = vector.extract_strided_slice %163 {offsets = [0, 192], sizes = [8, 64], strides = [1, 1]} : vector<8x256xf32> to vector<8x64xf32>
    %171 = math.tanh %170 : vector<8x64xf32>
    %172 = vector.extract_strided_slice %169 {offsets = [0, 0], sizes = [8, 64], strides = [1, 1]} : vector<8x192xf32> to vector<8x64xf32>
    %173 = vector.extract_strided_slice %169 {offsets = [0, 64], sizes = [8, 64], strides = [1, 1]} : vector<8x192xf32> to vector<8x64xf32>
    %174 = vector.extract_strided_slice %169 {offsets = [0, 128], sizes = [8, 64], strides = [1, 1]} : vector<8x192xf32> to vector<8x64xf32>
    %175 = arith.mulf %173, %156 : vector<8x64xf32>
    %176 = arith.mulf %172, %171 : vector<8x64xf32>
    %177 = arith.addf %175, %176 : vector<8x64xf32>
    %178 = math.tanh %177 : vector<8x64xf32>
    %179 = arith.mulf %174, %178 : vector<8x64xf32>
    %c8_i32 = arith.constant 8 : i32
    %c0_45 = arith.constant 0 : index
    %c0_46 = arith.constant 0 : index
    %180 = vector.load %arg5[%c0_45, %c0_46] : memref<64x128xf32, #tpu.memory_space<vmem>>, vector<64x128xf32>
    %cst_47 = arith.constant dense<0.000000e+00> : vector<8x128xf32>
    %181 = tpu.matmul %179, %180, %cst_47 {dimension_numbers = #tpu.dot_dimension_numbers<[1], [0], [0], [1], [0, 0, 1, 1], [], []>} : vector<8x64xf32>, vector<64x128xf32>, vector<8x128xf32> -> vector<8x128xf32>
    %c0_48 = arith.constant 0 : index
    %c0_49 = arith.constant 0 : index
    %182 = vector.load %arg6[%c0_48, %c0_49] : memref<1x128xf32, #tpu.memory_space<vmem>>, vector<1x128xf32>
    %183 = vector.broadcast %182 : vector<1x128xf32> to vector<8x128xf32>
    %184 = arith.addf %181, %183 : vector<8x128xf32>
    %c0_50 = arith.constant 0 : index
    %c0_51 = arith.constant 0 : index
    %185 = vector.load %arg7[%c0_50, %c0_51] : memref<8x128xf32, #tpu.memory_space<vmem>>, vector<8x128xf32>
    tpu.vector_store %arg7[%c0_50, %c0_51], %184 {strides = array<i32>} : memref<8x128xf32, #tpu.memory_space<vmem>>, vector<8x128xf32>,
    return
  }
  func.func @transform_0(%arg0: i32) -> (i32, i32, i32) {
    %c0_i32 = arith.constant 0 : i32
    %c0_i32_0 = arith.constant 0 : i32
    %c0_i32_1 = arith.constant 0 : i32
    return %c0_i32, %arg0, %c0_i32_0 : i32, i32, i32
  }
  func.func @transform_1(%arg0: i32) -> (i32, i32) {
    %c0_i32 = arith.constant 0 : i32
    %c0_i32_0 = arith.constant 0 : i32
    %c0_i32_1 = arith.constant 0 : i32
    return %c0_i32, %c0_i32_0 : i32, i32
  }
  func.func @transform_2(%arg0: i32) -> (i32, i32) {
    %c0_i32 = arith.constant 0 : i32
    %c0_i32_0 = arith.constant 0 : i32
    %c0_i32_1 = arith.constant 0 : i32
    return %c0_i32, %c0_i32_0 : i32, i32
  }
  func.func @transform_3(%arg0: i32) -> (i32, i32) {
    %c0_i32 = arith.constant 0 : i32
    %c0_i32_0 = arith.constant 0 : i32
    %c0_i32_1 = arith.constant 0 : i32
    return %c0_i32, %c0_i32_0 : i32, i32
  }
  func.func @transform_4(%arg0: i32) -> (i32, i32) {
    %c0_i32 = arith.constant 0 : i32
    %c0_i32_0 = arith.constant 0 : i32
    %c0_i32_1 = arith.constant 0 : i32
    return %c0_i32, %c0_i32_0 : i32, i32
  }
  func.func @transform_5(%arg0: i32) -> (i32, i32) {
    %c0_i32 = arith.constant 0 : i32
    %c0_i32_0 = arith.constant 0 : i32
    %c0_i32_1 = arith.constant 0 : i32
    return %c0_i32, %c0_i32_0 : i32, i32
  }
  func.func @transform_6(%arg0: i32) -> (i32, i32) {
    %c0_i32 = arith.constant 0 : i32
    %c0_i32_0 = arith.constant 0 : i32
    return %arg0, %c0_i32 : i32, i32
  }
}

</mosaic_0001>

<bundles_post_ra>
// kernel: tpu_custom_call.1
= control target key start
LH: loop header
LB: loop body
LE: loop exit
PB: predicated region body
PF: predicated region fallthrough
CT: control target
= control target key end

     0   :  { %11 = vsyncpa [#allocation4], 0  ;;  %s2065_s0 = inlined_call_operand.hbm [shape: f32[8,8,28], index: 0, kind: input, shape index: {}]   ;;  %s2066_s1 = inlined_call_operand.hbm [shape: f32[28,256], index: 1, kind: input, shape index: {}]   ;;  %s2067_s2 = inlined_call_operand.hbm [shape: f32[64,256], index: 2, kind: input, shape index: {}]   ;;  %s2068_s3 = inlined_call_operand.vmem [shape: f32[1,256], index: 3, kind: input, shape index: {}]   ;;  %s2069_s4 = inlined_call_operand.hbm [shape: f32[64,128], index: 4, kind: input, shape index: {}]   ;;  %s2070_s5 = inlined_call_operand.vmem [shape: f32[1,128], index: 5, kind: input, shape index: {}]   ;;  %s2071_s6 = inlined_call_operand.hbm [shape: f32[8,128], index: 6, kind: output, shape index: {}]  }
   0x1   :  { %12 = vsyncpa [#allocation7], 0 }
   0x2   :  { %13 = vsyncpa [#allocation10], 0 }
   0x3   :  { %14 = vsyncpa [#allocation5], 0  ;;  %s1735_s21 = smov [#allocation6]   ;;  %s1617_s25 = scalar_lea.hbm %s2066_s1, 1024 }
   0x4   :  { %s32_s22 = sshll.u32 %s1735_s21, 4  ;;  %p1618_p0 = scmp.ne.s32.totalorder %s2066_s1, %s1617_s25  ;;  %s33_s22 = int_to_ptr.vmem [resolvable:$true] %s32_s22 }
   0x5   :  { %p1621_p1 = scmp.lt.u32.totalorder %s1617_s25, %s2066_s1 }
   0x7   :  { %p1623_p2 = pnand %p1621_p1, %p1618_p0 }
   0x9   :  { %1626 = shalt.err (!%p1623_p2)
}
   0xa   :  { %s1627_s30 = scalar_lea.vmem %s33_s22, 1024  ;;  %p1632_p4 = scmp.lt.s32.totalorder %s33_s22, %s33_s22 }
   0xb   :  { %p1628_p3 = scmp.ne.s32.totalorder %s33_s22, %s1627_s30  ;;  %p1633_p5 = scmp.lt.s32.totalorder %s1627_s30, %s1627_s30 }
   0xd   :  { %p1634_p6 = por %p1633_p5, %p1632_p4 }
   0xf   :  { %p1635_p7 = pnand %p1634_p6, %p1628_p3 }
  0x11   :  { %1638 = shalt.err (!%p1635_p7)
}
  0x12   :  { %s1736_s7 = smov 256   ;;  %s1737_s8 = smov 16  }
  0x13   :  { %38 = dma.hbm_to_vmem [thread:$0]  %s2066_s1, 1024, %s33_s22, [#allocation7], %s1736_s7, %s1736_s7, %s1737_s8  }
  0x14   :  { %s1738_s11 = smov [#allocation3]   ;;  %s1639_s15 = scalar_lea.hbm %s2065_s0, 1024 }
  0x15   :  { %s20_s12 = sshll.u32 %s1738_s11, 4  ;;  %p1640_p8 = scmp.ne.s32.totalorder %s2065_s0, %s1639_s15  ;;  %s21_s12 = int_to_ptr.vmem [resolvable:$true] %s20_s12 }
  0x16   :  { %p1643_p9 = scmp.lt.u32.totalorder %s1639_s15, %s2065_s0 }
  0x18   :  { %p1645_p10 = pnand %p1643_p9, %p1640_p8 }
  0x1a   :  { %1648 = shalt.err (!%p1645_p10)
}
  0x1b   :  { %s1649_s20 = scalar_lea.vmem %s21_s12, 1024  ;;  %p1654_p12 = scmp.lt.s32.totalorder %s21_s12, %s21_s12 }
  0x1c   :  { %p1650_p11 = scmp.ne.s32.totalorder %s21_s12, %s1649_s20  ;;  %p1655_p13 = scmp.lt.s32.totalorder %s1649_s20, %s1649_s20 }
  0x1e   :  { %p1656_p0 = por %p1655_p13, %p1654_p12 }
  0x20   :  { %p1657_p1 = pnand %p1656_p0, %p1650_p11 }
  0x22   :  { %1660 = shalt.err (!%p1657_p1)
}
  0x23   :  { %s1739_s1 = smov 128   ;;  %s1740_s21 = smov 8  }
  0x24   :  { %26 = dma.hbm_to_vmem [thread:$0]  %s2065_s0, 1024, %s21_s12, [#allocation4], %s1739_s1, %s1739_s1, %s1740_s21  }
  0x25   :  { %s1741_s24 = smov [#allocation8]   ;;  %s1742_s26 = smov [#allocation9]  }
  0x26   :  { %s44_s25 = sshll.u32 %s1741_s24, 4  ;;  %s58_s27 = sshll.u32 %s1742_s26, 4  ;;  %s45_s25 = int_to_ptr.vmem [resolvable:$true] %s44_s25  ;;  %s1814_s27 = int_to_ptr.vmem [resolvable:$true] %s58_s27 }
  0x27   :  { %s1661_s30 = scalar_lea.hbm %s2067_s2, 2048 }
  0x28   :  { %p1662_p2 = scmp.ne.s32.totalorder %s2067_s2, %s1661_s30  ;;  %p1665_p3 = scmp.lt.u32.totalorder %s1661_s30, %s2067_s2 }
  0x2a   :  { %p1667_p4 = pnand %p1665_p3, %p1662_p2 }
  0x2c   :  { %1670 = shalt.err (!%p1667_p4)
}
  0x2d   :  { %s1671_s0 = scalar_lea.vmem %s45_s25, 2048  ;;  %p1676_p6 = scmp.lt.s32.totalorder %s45_s25, %s45_s25 }
  0x2e   :  { %p1672_p5 = scmp.ne.s32.totalorder %s45_s25, %s1671_s0  ;;  %p1677_p7 = scmp.lt.s32.totalorder %s1671_s0, %s1671_s0 }
  0x30   :  { %p1678_p8 = por %p1677_p7, %p1676_p6 }
  0x32   :  { %p1679_p9 = pnand %p1678_p8, %p1672_p5 }
  0x34   :  { %1682 = shalt.err (!%p1679_p9)
}
  0x35   :  { %50 = dma.hbm_to_vmem [thread:$0]  %s2067_s2, 2048, %s45_s25, [#allocation7], %s1736_s7, %s1736_s7, %s1737_s8  }
  0x36   :  { %s1683_s17 = scalar_lea.hbm %s2069_s4, 1024 }
  0x37   :  { %p1684_p10 = scmp.ne.s32.totalorder %s2069_s4, %s1683_s17  ;;  %p1687_p11 = scmp.lt.u32.totalorder %s1683_s17, %s2069_s4 }
  0x39   :  { %p1689_p12 = pnand %p1687_p11, %p1684_p10 }
  0x3b   :  { %1692 = shalt.err (!%p1689_p12)
}
  0x3c   :  { %s1693_s23 = scalar_lea.vmem %s1814_s27, 1024  ;;  %p1698_p0 = scmp.lt.s32.totalorder %s1814_s27, %s1814_s27 }
  0x3d   :  { %p1694_p13 = scmp.ne.s32.totalorder %s1814_s27, %s1693_s23  ;;  %p1699_p1 = scmp.lt.s32.totalorder %s1693_s23, %s1693_s23 }
  0x3f   :  { %p1700_p2 = por %p1699_p1, %p1698_p0 }
  0x41   :  { %p1701_p3 = pnand %p1700_p2, %p1694_p13 }
  0x43   :  { %1704 = shalt.err (!%p1701_p3)
}
  0x44   :  { %64 = dma.hbm_to_vmem [thread:$0]  %s2069_s4, 1024, %s1814_s27, [#allocation10], %s1739_s1, %s1739_s1, %s1740_s21  }
  0x45   :  { %1727 = dma.done.wait [#allocation4], 1024  }
  0x46   :  { %1728 = vsyncadd [#allocation4], 4294966272 }
  0x47   :  { %1729 = dma.done.wait [#allocation7], 3072  }
  0x48   :  { %1730 = vsyncadd [#allocation7], 4294964224 }
  0x49   :  { %1731 = dma.done.wait [#allocation10], 1024  }
  0x4a   :  { %1732 = vsyncadd [#allocation10], 4294966272  ;;  %v1743_v0 = vmov 0.0   ;;  %vm132_vm0 = vcmask 1043456   ;;  %v88_v1 = vld [vmem:[#allocation6 + $0x8] sm:$0xff]  ;;  %v90_v2 = vld [vmem:[#allocation6 + $0x18] sm:$0xff]  ;;  %v97_v50 = vlaneseq }
  0x4b   :  { %203 = vmatprep.mubr.f32.mxu1 %v1743_v0  ;;  %681 = vmatprep.mubr.f32.mxu0 %v1743_v0  ;;  %v87_v3 = vld [vmem:[#allocation6] sm:$0xff]  ;;  %v1325_v4 = vpack.c.bf16 %v90_v2, %v88_v1  ;;  %v89_v5 = vld [vmem:[#allocation6 + $0x10] sm:$0xff]  ;;  %v92_v6 = vld [vmem:[#allocation6 + $0x28] sm:$0xff]  ;;  %vm1744_vm1 = vmmov 1   ;;  %vm107_vm3 = vcmask 228352   ;;  %s1745_s1 = smov 64  }
  0x4c   :  { %v94_v7 = vld [vmem:[#allocation6 + $0x38] sm:$0xf]  ;;  %v1327_v8 = vpack.c.bf16 %v89_v5, %v87_v3  ;;  %vm1853_vm2 = vmpackc.low %vm132_vm0, %vm1744_vm1  ;;  %v91_v11 = vld [vmem:[#allocation6 + $0x20] sm:$0xff]  ;;  %v98_v53 = vshrl.u32 %v97_v50, 7  ;;  %vm286_vm4 = vcmask 523264   ;;  %vm1747_vm5 = vmmov 0  }
  0x4d   :  { %v1329_v9 = vpack.c.bf16 %v94_v7, %v92_v6  ;;  %v93_v12 = vld [vmem:[#allocation6 + $0x30] sm:$0xf]  ;;  %1326 = vmatprep.subr.bf16.mxu1 %v1325_v4  ;;  %v269_v13 = vld [vmem:[#allocation8 + $0x8] sm:$0xff]  ;;  %v271_v14 = vld [vmem:[#allocation8 + $0x18] sm:$0xff]  ;;  %s1748_s24 = smov [#allocation11]  }
  0x4e   :  { %v268_v15 = vld [vmem:[#allocation8] sm:$0xff]  ;;  %1328 = vmatpush1.bf16.msra.mxu1 %v1327_v8  ;;  %v1332_v16 = vpack.c.bf16 %v93_v12, %v91_v11  ;;  %v1857_v17 = vpack.c.bf16 %v271_v14, %v269_v13  ;;  %v270_v18 = vld [vmem:[#allocation8 + $0x10] sm:$0xff]  ;;  %v273_v20 = vld [vmem:[#allocation8 + $0x28] sm:$0xff]  ;;  %v103_v56 = vsub.s32 1, %v98_v53  ;;  %v99_v2 = vsub.s32 0, %v98_v53  ;;  %s1251_s25 = sshll.u32 %s1748_s24, 4  ;;  %s1252_s25 = int_to_ptr.vmem [resolvable:$true] %s1251_s25 }
  0x4f   :  { %1331 = vmatprep.subr.msk.bf16.mxu1 %vm1853_vm2, %v1329_v9  ;;  %v1861_v19 = vpack.c.bf16 %v270_v18, %v268_v15  ;;  %v275_v21 = vld [vmem:[#allocation8 + $0x38] sm:$0xff]  ;;  %v272_v23 = vld [vmem:[#allocation8 + $0x20] sm:$0xff]  ;;  %v274_v24 = vld [vmem:[#allocation8 + $0x30] sm:$0xff]  ;;  %s1705_s26 = scalar_lea.vmem %s1252_s25, 128  ;;  %p1710_p5 = scmp.lt.s32.totalorder %s1252_s25, %s1252_s25 }
  0x50   :  { %v1863_v22 = vpack.c.bf16 %v275_v21, %v273_v20  ;;  %1384 = vmatprep.subr.bf16.mxu0 %v1857_v17  ;;  %v79_v25 = vld [vmem:[#allocation3] sm:$0xff]  ;;  %v277_v26 = vld [vmem:[#allocation8 + $0x48] sm:$0xff]  ;;  %v279_v27 = vld [vmem:[#allocation8 + $0x58] sm:$0xff]  ;;  %v1871_v28 = vpack.c.bf16 %v274_v24, %v272_v23  ;;  %p1706_p4 = scmp.ne.s32.totalorder %s1252_s25, %s1705_s26  ;;  %p1711_p6 = scmp.lt.s32.totalorder %s1705_s26, %s1705_s26 }
  0x51   :  { %1386 = vmatpush1.bf16.msra.mxu0 %v1861_v19  ;;  %v276_v29 = vld [vmem:[#allocation8 + $0x40] sm:$0xff]  ;;  %v278_v30 = vld [vmem:[#allocation8 + $0x50] sm:$0xff]  ;;  %v1874_v31 = vpack.c.bf16 %v279_v27, %v277_v26  ;;  %v80_v32 = vld [vmem:[#allocation3 + $0x8] sm:$0xff] }
  0x52   :  { %1334 = vmatpush1.bf16.msk.msra.mxu1 %vm1853_vm2, %v1332_v16  ;;  %1388 = vmatprep.subr.bf16.mxu0 %v1863_v22  ;;  %v281_v33 = vld [vmem:[#allocation8 + $0x68] sm:$0xff]  ;;  %v283_v34 = vld [vmem:[#allocation8 + $0x78] sm:$0xff]  ;;  %v1880_v35 = vpack.c.bf16 %v278_v30, %v276_v29  ;;  %v280_v36 = vld [vmem:[#allocation8 + $0x60] sm:$0xff]  ;;  %p1712_p7 = por %p1711_p6, %p1710_p5 }
  0x53   :  { %1336 = vmatprep.subr.bf16.mxu1 %v1857_v17  ;;  %v282_v37 = vld [vmem:[#allocation8 + $0x70] sm:$0xff]  ;;  %v1884_v38 = vpack.c.bf16 %v283_v34, %v281_v33  ;;  %v82_v41 = vld [vmem:[#allocation3 + $0x18] sm:$0xff]  ;;  %v83_v42 = vld [vmem:[#allocation3 + $0x20] sm:$0xff] }
  0x54   :  { %v81_v39 = vld [vmem:[#allocation3 + $0x10] sm:$0xff]  ;;  %v1890_v40 = vpack.c.bf16 %v282_v37, %v280_v36  ;;  %v84_v43 = vld [vmem:[#allocation3 + $0x28] sm:$0xff]  ;;  %v86_v45 = vld [vmem:[#allocation3 + $0x38] sm:$0xff]  ;;  %p1713_p8 = pnand %p1712_p7, %p1706_p4 }
  0x55   :  { %1264 = vmatmul.mubr.msk.f32.vlgmr.msra.gmra.mrb[0].mxu1 %vm107_vm3, %v79_v25  ;;  %1390 = vmatpush1.bf16.msra.mxu0 %v1871_v28  ;;  %v85_v44 = vld [vmem:[#allocation3 + $0x30] sm:$0xff]  ;;  %v95_v58 = vld [vmem:[%s2068_s3] sm:$0x3] }
  0x56   :  { %1338 = vmatpush1.bf16.msra.mxu1 %v1861_v19  ;;  %209 = vmatprep.mubr.f32.mxu1 %v1743_v0  ;;  %v1944_v60 = vrot.slane %v95_v58, %v103_v56  ;;  %v1948_v3 = vrot.slane %v95_v58, %v99_v2 }
  0x57   :  { %1340 = vmatprep.subr.bf16.mxu1 %v1863_v22  ;;  %1392 = vmatprep.subr.bf16.mxu0 %v1874_v31 }
  0x59   :  { %1265 = vmatmul.mubr.msk.f32.gmra.mrb[2].mxu1 %vm107_vm3, %v80_v32  ;;  %1394 = vmatpush1.bf16.msra.mxu0 %v1880_v35 }
  0x5a   :  { %215 = vmatprep.mubr.f32.mxu1 %v1743_v0  ;;  %1342 = vmatpush1.bf16.msra.mxu1 %v1871_v28 }
  0x5b   :  { %1344 = vmatprep.subr.bf16.mxu1 %v1874_v31  ;;  %1396 = vmatprep.subr.bf16.mxu0 %v1884_v38 }
  0x5d   :  { %1266 = vmatmul.mubr.msk.f32.gmra.mrb[4].mxu1 %vm107_vm3, %v81_v39  ;;  %1398 = vmatpush1.bf16.msra.mxu0 %v1890_v40 }
  0x5e   :  { %221 = vmatprep.mubr.f32.mxu1 %v1743_v0  ;;  %1346 = vmatpush1.bf16.msra.mxu1 %v1880_v35 }
  0x5f   :  { %1348 = vmatprep.subr.bf16.mxu1 %v1884_v38  ;;  %1400 = vmatprep.subr.bf16.mxu0 %v1857_v17 }
  0x61   :  { %1267 = vmatmul.mubr.msk.f32.gmra.mrb[6].mxu1 %vm107_vm3, %v82_v41 }
  0x62   :  { %227 = vmatprep.mubr.f32.mxu1 %v1743_v0  ;;  %1350 = vmatpush1.bf16.msra.mxu1 %v1890_v40 }
  0x63   :  { %1352 = vmatprep.subr.bf16.mxu1 %v1857_v17 }
  0x65   :  { %1268 = vmatmul.mubr.msk.f32.gmra.mrb[8].mxu1 %vm107_vm3, %v83_v42 }
  0x66   :  { %233 = vmatprep.mubr.f32.mxu1 %v1743_v0 }
  0x69   :  { %1269 = vmatmul.mubr.msk.f32.gmra.mrb[10].mxu1 %vm107_vm3, %v84_v43 }
  0x6a   :  { %239 = vmatprep.mubr.f32.mxu1 %v1743_v0 }
  0x6d   :  { %1270 = vmatmul.mubr.msk.f32.gmra.mrb[12].mxu1 %vm107_vm3, %v85_v44 }
  0x6e   :  { %245 = vmatprep.mubr.f32.mxu1 %v1743_v0 }
  0x71   :  { %1271 = vmatmul.mubr.msk.f32.gmra.mrb[14].mxu1 %vm107_vm3, %v86_v45 }
  0x72   :  { %354 = vmatprep.mubr.f32.mxu1 %v1743_v0 }
  0x75   :  { %355 = vmatmul.mubr.f32.vlgmr.msra.gmra.mrb[0].mxu1 %v1743_v0 }
  0x76   :  { %1354 = vmatpush1.bf16.msra.mxu1 %v1861_v19  ;;  %463 = vmatprep.mubr.f32.mxu1 %v1743_v0 }
  0x77   :  { %1356 = vmatprep.subr.bf16.mxu1 %v1863_v22 }
  0x7a   :  { %1358 = vmatpush1.bf16.msra.mxu1 %v1871_v28 }
  0x7b   :  { %1360 = vmatprep.subr.bf16.mxu1 %v1874_v31 }
  0x7e   :  { %1362 = vmatpush1.bf16.msra.mxu1 %v1880_v35 }
  0x7f   :  { %1364 = vmatprep.subr.bf16.mxu1 %v1884_v38 }
  0x82   :  { %1366 = vmatpush1.bf16.msra.mxu1 %v1890_v40 }
  0x83   :  { %1368 = vmatprep.subr.bf16.mxu1 %v1857_v17 }
 0x134   :  { %v1921_v46 = vpop.f32.mrb[6].mxu1 }
 0x135   :  { %v1923_v47 = vpop.f32.mrb[7].mxu1 }
 0x138   :  { %v1925_v48 = vpop.f32.mrb[8].mxu1 }
 0x139   :  { %v1927_v49 = vpop.f32.mrb[9].mxu1 }
 0x13c   :  { %v1929_v51 = vpop.f32.mrb[10].mxu1 }
 0x13d   :  { %v1931_v52 = vpop.f32.mrb[11].mxu1 }
 0x140   :  { %v1933_v54 = vpop.f32.mrb[12].mxu1 }
 0x141   :  { %v1935_v55 = vpop.f32.mrb[13].mxu1 }
 0x144   :  { %v1937_v57 = vpop.f32.mrb[14].mxu1 }
 0x145   :  { %v1942_v59 = vpop.f32.mrb[15].mxu1 }
 0x148   :  { %v356_v61 = vpop.f32.mrb[0].mxu1 }
 0x149   :  { %v358_v62 = vpop.f32.mrb[1].mxu1  ;;  %v1475_v4 = vadd.f32 %v356_v61, %v1948_v3 }
 0x14a   :  { %v1476_v63 = vadd.f32 %v358_v62, %v1944_v60 }
 0x14b   :  { %v1272_v5 = vmul.f32 -1.442695, %v1475_v4 }
 0x14c   :  { %1521 = vtanh.f32 %v1476_v63  ;;  %v1273_v15 = vmul.f32 -1.442695, %v1476_v63 }
 0x14d   :  { %1523 = vpow2.f32 %v1272_v5 }
 0x156   :  { %v1522_v1 = vpop.eup %1521 }
 0x157   :  { %378 = vrot.lane.b32.xlu0 %v1522_v1, %s1745_s1  ;;  %v1524_v6 = vpop.eup %1523 }
 0x158   :  { %v369_v7 = vadd.f32 1.0, %v1524_v6 }
 0x15a   :  { %1525 = vrcp.f32 %v369_v7 }
 0x164   :  { %v1526_v8 = vpop.eup %1525 }
 0x165   :  { %v376_v11 = vmul.f32 0.0, %v1526_v8 }
 0x1c9   :  { %v379_v9 = vpop.permute.xlu0 %378 }
 0x1ca   :  { %v381_v10 = vmul.f32 %v1526_v8, %v379_v9 }
 0x1cc   :  { %383 = vrot.lane.b32.xlu0 %v381_v10, %s1745_s1 }
 0x23e   :  { %v384_v12 = vpop.permute.xlu0 %383 }
 0x23f   :  { %v386_v13 = vadd.f32 %v384_v12, %v376_v11 }
 0x241   :  { %1527 = vtanh.f32 %v386_v13 }
 0x242   :  { %1529 = vpow2.f32 %v1273_v15 }
 0x24b   :  { %v1528_v14 = vpop.eup %1527 }
 0x24c   :  { %389 = vrot.lane.b32.xlu1 %v1528_v14, %s1745_s1  ;;  %v1530_v16 = vpop.eup %1529 }
 0x24d   :  { %v370_v18 = vadd.f32 1.0, %v1530_v16 }
 0x24f   :  { %1531 = vrcp.f32 %v370_v18 }
 0x259   :  { %v1532_v20 = vpop.eup %1531 }
 0x2be   :  { %v390_v21 = vpop.permute.xlu1 %389 }
 0x2bf   :  { %v392_v23 = vmul.f32 %v1532_v20, %v390_v21 }
 0x2c1   :  { %1274 = vmatmul.mubr.msk.f32.vlgmr.msra.gmra.mrb[2].mxu1 %vm286_vm4, %v392_v23  ;;  %v224_v23 = vadd.f32 %v1921_v46, %v1948_v3 }
 0x2c2   :  { %1370 = vmatpush1.bf16.msra.mxu1 %v1861_v19  ;;  %572 = vmatprep.mubr.f32.mxu1 %v1743_v0 }
 0x2c3   :  { %1372 = vmatprep.subr.bf16.mxu1 %v1863_v22 }
 0x2c6   :  { %1374 = vmatpush1.bf16.msra.mxu1 %v1871_v28 }
 0x2c7   :  { %1376 = vmatprep.subr.bf16.mxu1 %v1874_v31 }
 0x2ca   :  { %1378 = vmatpush1.bf16.msra.mxu1 %v1880_v35 }
 0x2cb   :  { %1380 = vmatprep.subr.bf16.mxu1 %v1884_v38 }
 0x2ce   :  { %1382 = vmatpush1.bf16.msra.mxu1 %v1890_v40 }
 0x394   :  { %v465_v24 = vpop.f32.mrb[2].mxu1 }
 0x395   :  { %v467_v25 = vpop.f32.mrb[3].mxu1  ;;  %v1477_v29 = vadd.f32 %v465_v24, %v1948_v3  ;;  %v226_v24 = vadd.f32 %v1923_v47, %v1944_v60 }
 0x396   :  { %v1478_v26 = vadd.f32 %v467_v25, %v1944_v60 }
 0x397   :  { %v1275_v30 = vmul.f32 -1.442695, %v1477_v29 }
 0x398   :  { %1533 = vtanh.f32 %v1478_v26  ;;  %v1276_v44 = vmul.f32 -1.442695, %v1478_v26 }
 0x399   :  { %1535 = vpow2.f32 %v1275_v30 }
 0x3a2   :  { %v1534_v27 = vpop.eup %1533 }
 0x3a3   :  { %487 = vrot.lane.b32.xlu1 %v1534_v27, %s1745_s1  ;;  %v1536_v32 = vpop.eup %1535 }
 0x3a4   :  { %v478_v33 = vadd.f32 1.0, %v1536_v32 }
 0x3a6   :  { %1537 = vrcp.f32 %v478_v33 }
 0x3b0   :  { %v1538_v34 = vpop.eup %1537 }
 0x3b1   :  { %v485_v39 = vmul.f32 %v1538_v34, %v386_v13 }
 0x415   :  { %v488_v36 = vpop.permute.xlu1 %487 }
 0x416   :  { %v490_v37 = vmul.f32 %v1538_v34, %v488_v36 }
 0x418   :  { %492 = vrot.lane.b32.xlu0 %v490_v37, %s1745_s1 }
 0x48a   :  { %v493_v41 = vpop.permute.xlu0 %492 }
 0x48b   :  { %v495_v42 = vadd.f32 %v493_v41, %v485_v39 }
 0x48d   :  { %1539 = vtanh.f32 %v495_v42 }
 0x48e   :  { %1541 = vpow2.f32 %v1276_v44 }
 0x497   :  { %v1540_v43 = vpop.eup %1539 }
 0x498   :  { %498 = vrot.lane.b32.xlu1 %v1540_v43, %s1745_s1  ;;  %v1542_v45 = vpop.eup %1541 }
 0x499   :  { %v479_v50 = vadd.f32 1.0, %v1542_v45 }
 0x49b   :  { %1543 = vrcp.f32 %v479_v50 }
 0x4a5   :  { %v1544_v53 = vpop.eup %1543 }
 0x50a   :  { %v499_v56 = vpop.permute.xlu1 %498 }
 0x50b   :  { %v501_v58 = vmul.f32 %v1544_v53, %v499_v56 }
 0x50d   :  { %1277 = vmatmul.mubr.msk.f32.vlgmr.msra.gmra.mrb[4].mxu1 %vm286_vm4, %v501_v58  ;;  %v230_v58 = vadd.f32 %v1925_v48, %v1948_v3 }
 0x50e   :  { %1322 = vmatprep.mubr.msk.f32.mxu1 %vm1747_vm5, %v1743_v0 }
 0x5e0   :  { %v574_v61 = vpop.f32.mrb[4].mxu1 }
 0x5e1   :  { %v576_v62 = vpop.f32.mrb[5].mxu1  ;;  %v1479_v2 = vadd.f32 %v574_v61, %v1948_v3  ;;  %v232_v61 = vadd.f32 %v1927_v49, %v1944_v60 }
 0x5e2   :  { %v1480_v63 = vadd.f32 %v576_v62, %v1944_v60 }
 0x5e3   :  { %v1278_v4 = vmul.f32 -1.442695, %v1479_v2 }
 0x5e4   :  { %1545 = vtanh.f32 %v1480_v63  ;;  %v1279_v14 = vmul.f32 -1.442695, %v1480_v63 }
 0x5e5   :  { %1547 = vpow2.f32 %v1278_v4 }
 0x5ee   :  { %v1546_v1 = vpop.eup %1545 }
 0x5ef   :  { %596 = vrot.lane.b32.xlu0 %v1546_v1, %s1745_s1  ;;  %v1548_v5 = vpop.eup %1547 }
 0x5f0   :  { %v587_v6 = vadd.f32 1.0, %v1548_v5 }
 0x5f2   :  { %1549 = vrcp.f32 %v587_v6 }
 0x5fc   :  { %v1550_v7 = vpop.eup %1549 }
 0x5fd   :  { %v594_v10 = vmul.f32 %v1550_v7, %v495_v42 }
 0x661   :  { %v597_v8 = vpop.permute.xlu0 %596 }
 0x662   :  { %v599_v9 = vmul.f32 %v1550_v7, %v597_v8 }
 0x664   :  { %601 = vrot.lane.b32.xlu1 %v599_v9, %s1745_s1 }
 0x6d6   :  { %v602_v11 = vpop.permute.xlu1 %601 }
 0x6d7   :  { %v604_v12 = vadd.f32 %v602_v11, %v594_v10 }
 0x6d9   :  { %1551 = vtanh.f32 %v604_v12 }
 0x6da   :  { %1553 = vpow2.f32 %v1279_v14 }
 0x6e3   :  { %v1552_v13 = vpop.eup %1551 }
 0x6e4   :  { %607 = vrot.lane.b32.xlu0 %v1552_v13, %s1745_s1  ;;  %v1554_v15 = vpop.eup %1553 }
 0x6e5   :  { %v588_v16 = vadd.f32 1.0, %v1554_v15 }
 0x6e7   :  { %1555 = vrcp.f32 %v588_v16 }
 0x6f1   :  { %v1556_v18 = vpop.eup %1555 }
 0x756   :  { %v608_v20 = vpop.permute.xlu0 %607 }
 0x757   :  { %v610_v21 = vmul.f32 %v1556_v18, %v608_v20 }
 0x759   :  { %1280 = vmatmul.mubr.msk.f32.vlgmr.msra.gmra.mrb[0].mxu0 %vm286_vm4, %v610_v21  ;;  %v236_v21 = vadd.f32 %v1929_v51, %v1948_v3 }
 0x75a   :  { %1402 = vmatpush1.bf16.msra.mxu0 %v1861_v19  ;;  %790 = vmatprep.mubr.f32.mxu0 %v1743_v0 }
 0x75b   :  { %1404 = vmatprep.subr.bf16.mxu0 %v1863_v22 }
 0x75e   :  { %1406 = vmatpush1.bf16.msra.mxu0 %v1871_v28 }
 0x75f   :  { %1408 = vmatprep.subr.bf16.mxu0 %v1874_v31 }
 0x762   :  { %1410 = vmatpush1.bf16.msra.mxu0 %v1880_v35 }
 0x763   :  { %1412 = vmatprep.subr.bf16.mxu0 %v1884_v38 }
 0x766   :  { %1414 = vmatpush1.bf16.msra.mxu0 %v1890_v40 }
 0x767   :  { %1416 = vmatprep.subr.bf16.mxu0 %v1857_v17 }
 0x82c   :  { %v683_v25 = vpop.f32.mrb[0].mxu0 }
 0x82d   :  { %v688_v26 = vadd.f32 %v683_v25, %v224_v23  ;;  %v685_v27 = vpop.f32.mrb[1].mxu0  ;;  %v238_v23 = vadd.f32 %v1931_v52, %v1944_v60 }
 0x82e   :  { %v689_v29 = vadd.f32 %v685_v27, %v226_v24 }
 0x82f   :  { %v1281_v32 = vmul.f32 -1.442695, %v688_v26 }
 0x830   :  { %1557 = vtanh.f32 %v689_v29  ;;  %v1282_v43 = vmul.f32 -1.442695, %v689_v29 }
 0x831   :  { %1559 = vpow2.f32 %v1281_v32 }
 0x83a   :  { %v1558_v30 = vpop.eup %1557 }
 0x83b   :  { %705 = vrot.lane.b32.xlu1 %v1558_v30, %s1745_s1  ;;  %v1560_v33 = vpop.eup %1559 }
 0x83c   :  { %v696_v34 = vadd.f32 1.0, %v1560_v33 }
 0x83e   :  { %1561 = vrcp.f32 %v696_v34 }
 0x848   :  { %v1562_v36 = vpop.eup %1561 }
 0x849   :  { %v703_v46 = vmul.f32 %v1562_v36, %v604_v12 }
 0x8ad   :  { %v706_v37 = vpop.permute.xlu1 %705 }
 0x8ae   :  { %v708_v39 = vmul.f32 %v1562_v36, %v706_v37 }
 0x8b0   :  { %710 = vrot.lane.b32.xlu0 %v708_v39, %s1745_s1 }
 0x922   :  { %v711_v47 = vpop.permute.xlu0 %710 }
 0x923   :  { %v713_v41 = vadd.f32 %v711_v47, %v703_v46 }
 0x925   :  { %1563 = vtanh.f32 %v713_v41 }
 0x926   :  { %1565 = vpow2.f32 %v1282_v43 }
 0x92f   :  { %v1564_v42 = vpop.eup %1563 }
 0x930   :  { %716 = vrot.lane.b32.xlu1 %v1564_v42, %s1745_s1  ;;  %v1566_v44 = vpop.eup %1565 }
 0x931   :  { %v697_v45 = vadd.f32 1.0, %v1566_v44 }
 0x933   :  { %1567 = vrcp.f32 %v697_v45  ;;  %v242_v45 = vadd.f32 %v1933_v54, %v1948_v3 }
 0x93d   :  { %v1568_v50 = vpop.eup %1567 }
 0x9a2   :  { %v717_v53 = vpop.permute.xlu1 %716 }
 0x9a3   :  { %v719_v56 = vmul.f32 %v1568_v50, %v717_v53 }
 0x9a5   :  { %1283 = vmatmul.mubr.msk.f32.vlgmr.msra.gmra.mrb[2].mxu0 %vm286_vm4, %v719_v56 }
 0x9a6   :  { %1418 = vmatpush1.bf16.msra.mxu0 %v1861_v19  ;;  %899 = vmatprep.mubr.f32.mxu0 %v1743_v0 }
 0x9a7   :  { %1420 = vmatprep.subr.bf16.mxu0 %v1863_v22 }
 0x9aa   :  { %1422 = vmatpush1.bf16.msra.mxu0 %v1871_v28 }
 0x9ab   :  { %1424 = vmatprep.subr.bf16.mxu0 %v1874_v31 }
 0x9ae   :  { %1426 = vmatpush1.bf16.msra.mxu0 %v1880_v35 }
 0x9af   :  { %1428 = vmatprep.subr.bf16.mxu0 %v1884_v38 }
 0x9b2   :  { %1430 = vmatpush1.bf16.msra.mxu0 %v1890_v40 }
 0x9b3   :  { %1432 = vmatprep.subr.bf16.mxu0 %v1857_v17 }
 0xa78   :  { %v792_v62 = vpop.f32.mrb[2].mxu0 }
 0xa79   :  { %v797_v63 = vadd.f32 %v792_v62, %v230_v58  ;;  %v794_v1 = vpop.f32.mrb[3].mxu0 }
 0xa7a   :  { %v798_v2 = vadd.f32 %v794_v1, %v232_v61 }
 0xa7b   :  { %v1284_v5 = vmul.f32 -1.442695, %v797_v63 }
 0xa7c   :  { %1569 = vtanh.f32 %v798_v2  ;;  %v1285_v13 = vmul.f32 -1.442695, %v798_v2 }
 0xa7d   :  { %1571 = vpow2.f32 %v1284_v5 }
 0xa86   :  { %v1570_v4 = vpop.eup %1569 }
 0xa87   :  { %814 = vrot.lane.b32.xlu0 %v1570_v4, %s1745_s1  ;;  %v1572_v6 = vpop.eup %1571 }
 0xa88   :  { %v805_v7 = vadd.f32 1.0, %v1572_v6 }
 0xa8a   :  { %1573 = vrcp.f32 %v805_v7 }
 0xa94   :  { %v1574_v8 = vpop.eup %1573 }
 0xa95   :  { %v812_v48 = vmul.f32 %v1574_v8, %v713_v41 }
 0xaf9   :  { %v815_v9 = vpop.permute.xlu0 %814 }
 0xafa   :  { %v817_v10 = vmul.f32 %v1574_v8, %v815_v9  ;;  %v248_v8 = vadd.f32 %v1937_v57, %v1948_v3  ;;  %v250_v9 = vadd.f32 %v1942_v59, %v1944_v60  ;;  %v1156_v57 = vld [vmem:[#allocation9] sm:$0xff]  ;;  %v1157_v59 = vld [vmem:[#allocation9 + $0x8] sm:$0xff]  ;;  %v1746_v3 = vmov 0.0|0.0  }
 0xafb   :  { %1463 = vmatprep.subr.bf16.mxu1 %v1746_v3 }
 0xafc   :  { %819 = vrot.lane.b32.xlu1 %v817_v10, %s1745_s1 }
 0xb6e   :  { %v820_v49 = vpop.permute.xlu1 %819 }
 0xb6f   :  { %v822_v11 = vadd.f32 %v820_v49, %v812_v48 }
 0xb71   :  { %1575 = vtanh.f32 %v822_v11 }
 0xb72   :  { %1577 = vpow2.f32 %v1285_v13 }
 0xb7b   :  { %v1576_v12 = vpop.eup %1575 }
 0xb7c   :  { %825 = vrot.lane.b32.xlu0 %v1576_v12, %s1745_s1  ;;  %v1578_v14 = vpop.eup %1577 }
 0xb7d   :  { %v806_v15 = vadd.f32 1.0, %v1578_v14 }
 0xb7f   :  { %1579 = vrcp.f32 %v806_v15 }
 0xb89   :  { %v1580_v16 = vpop.eup %1579 }
 0xbee   :  { %v826_v18 = vpop.permute.xlu0 %825 }
 0xbef   :  { %v828_v20 = vmul.f32 %v1580_v16, %v826_v18 }
 0xbf1   :  { %1286 = vmatmul.mubr.msk.f32.vlgmr.msra.gmra.mrb[4].mxu0 %vm286_vm4, %v828_v20 }
 0xbf2   :  { %1434 = vmatpush1.bf16.msra.mxu0 %v1861_v19  ;;  %1008 = vmatprep.mubr.f32.mxu0 %v1743_v0 }
 0xbf3   :  { %1436 = vmatprep.subr.bf16.mxu0 %v1863_v22 }
 0xbf6   :  { %1438 = vmatpush1.bf16.msra.mxu0 %v1871_v28 }
 0xbf7   :  { %1440 = vmatprep.subr.bf16.mxu0 %v1874_v31 }
 0xbfa   :  { %1442 = vmatpush1.bf16.msra.mxu0 %v1880_v35 }
 0xbfb   :  { %1444 = vmatprep.subr.bf16.mxu0 %v1884_v38 }
 0xbfe   :  { %1446 = vmatpush1.bf16.msra.mxu0 %v1890_v40 }
 0xbff   :  { %1448 = vmatprep.subr.bf16.mxu0 %v1857_v17 }
 0xcc4   :  { %v901_v24 = vpop.f32.mrb[4].mxu0 }
 0xcc5   :  { %v906_v25 = vadd.f32 %v901_v24, %v236_v21  ;;  %v903_v26 = vpop.f32.mrb[5].mxu0  ;;  %v1464_v21 = vpack.c.bf16 %v1157_v59, %v1156_v57 }
 0xcc6   :  { %v907_v27 = vadd.f32 %v903_v26, %v238_v23  ;;  %v1159_v23 = vld [vmem:[#allocation9 + $0x18] sm:$0xff]  ;;  %v1161_v26 = vld [vmem:[#allocation9 + $0x28] sm:$0xff] }
 0xcc7   :  { %v1287_v30 = vmul.f32 -1.442695, %v906_v25  ;;  %1465 = vmatpush3.bf16.msra.mxu1 %v1464_v21  ;;  %v1160_v25 = vld [vmem:[#allocation9 + $0x20] sm:$0xff] }
 0xcc8   :  { %1581 = vtanh.f32 %v907_v27  ;;  %v1288_v46 = vmul.f32 -1.442695, %v907_v27  ;;  %1466 = vmatprep.subr.bf16.mxu1 %v1746_v3  ;;  %v1470_v27 = vpack.c.bf16 %v1161_v26, %v1160_v25 }
 0xcc9   :  { %1583 = vpow2.f32 %v1287_v30  ;;  %v1163_v30 = vld [vmem:[#allocation9 + $0x38] sm:$0xff] }
 0xcd2   :  { %v1582_v29 = vpop.eup %1581 }
 0xcd3   :  { %923 = vrot.lane.b32.xlu1 %v1582_v29, %s1745_s1  ;;  %v1584_v32 = vpop.eup %1583  ;;  %v1162_v29 = vld [vmem:[#allocation9 + $0x30] sm:$0xff] }
 0xcd4   :  { %v914_v33 = vadd.f32 1.0, %v1584_v32  ;;  %v1473_v32 = vpack.c.bf16 %v1163_v30, %v1162_v29 }
 0xcd6   :  { %1585 = vrcp.f32 %v914_v33 }
 0xce0   :  { %v1586_v17 = vpop.eup %1585 }
 0xce1   :  { %v921_v51 = vmul.f32 %v1586_v17, %v822_v11 }
 0xd45   :  { %v924_v34 = vpop.permute.xlu1 %923 }
 0xd46   :  { %v926_v36 = vmul.f32 %v1586_v17, %v924_v34 }
 0xd48   :  { %928 = vrot.lane.b32.xlu0 %v926_v36, %s1745_s1 }
 0xdba   :  { %v929_v52 = vpop.permute.xlu0 %928 }
 0xdbb   :  { %v931_v37 = vadd.f32 %v929_v52, %v921_v51 }
 0xdbd   :  { %1587 = vtanh.f32 %v931_v37 }
 0xdbe   :  { %1589 = vpow2.f32 %v1288_v46 }
 0xdc7   :  { %v1588_v39 = vpop.eup %1587 }
 0xdc8   :  { %934 = vrot.lane.b32.xlu1 %v1588_v39, %s1745_s1  ;;  %v1590_v47 = vpop.eup %1589 }
 0xdc9   :  { %v915_v41 = vadd.f32 1.0, %v1590_v47 }
 0xdcb   :  { %1591 = vrcp.f32 %v915_v41  ;;  %v1295_v41 = vld [vmem:[%s2070_s5] ss:$0 sm:$0xff] }
 0xdd5   :  { %v1592_v42 = vpop.eup %1591 }
 0xe3a   :  { %v935_v43 = vpop.permute.xlu1 %934 }
 0xe3b   :  { %v937_v44 = vmul.f32 %v1592_v42, %v935_v43 }
 0xe3d   :  { %1289 = vmatmul.mubr.msk.f32.vlgmr.msra.gmra.mrb[6].mxu0 %vm286_vm4, %v937_v44 }
 0xe3e   :  { %1450 = vmatpush1.bf16.msra.mxu0 %v1861_v19  ;;  %1117 = vmatprep.mubr.f32.mxu0 %v1743_v0  ;;  %v244_v19 = vadd.f32 %v1935_v55, %v1944_v60  ;;  %v1158_v60 = vld [vmem:[#allocation9 + $0x10] sm:$0xff] }
 0xe3f   :  { %1452 = vmatprep.subr.bf16.mxu0 %v1863_v22  ;;  %v1467_v24 = vpack.c.bf16 %v1159_v23, %v1158_v60 }
 0xe41   :  { %1468 = vmatpush3.bf16.msra.mxu1 %v1467_v24 }
 0xe42   :  { %1454 = vmatpush1.bf16.msra.mxu0 %v1871_v28  ;;  %1469 = vmatprep.subr.bf16.mxu1 %v1746_v3 }
 0xe43   :  { %1456 = vmatprep.subr.bf16.mxu0 %v1874_v31 }
 0xe45   :  { %1471 = vmatpush3.bf16.msra.mxu1 %v1470_v27 }
 0xe46   :  { %1458 = vmatpush1.bf16.msra.mxu0 %v1880_v35  ;;  %1472 = vmatprep.subr.bf16.mxu1 %v1746_v3 }
 0xe47   :  { %1460 = vmatprep.subr.bf16.mxu0 %v1884_v38 }
 0xe49   :  { %1474 = vmatpush3.bf16.msra.mxu1 %v1473_v32 }
 0xe4a   :  { %1462 = vmatpush1.bf16.msra.mxu0 %v1890_v40 }
 0xf10   :  { %v1010_v50 = vpop.f32.mrb[6].mxu0 }
 0xf11   :  { %v1015_v53 = vadd.f32 %v1010_v50, %v242_v45  ;;  %v1012_v56 = vpop.f32.mrb[7].mxu0 }
 0xf12   :  { %v1016_v22 = vadd.f32 %v1012_v56, %v244_v19 }
 0xf13   :  { %v1290_v31 = vmul.f32 -1.442695, %v1015_v53 }
 0xf14   :  { %1593 = vtanh.f32 %v1016_v22  ;;  %v1291_v1 = vmul.f32 -1.442695, %v1016_v22 }
 0xf15   :  { %1595 = vpow2.f32 %v1290_v31 }
 0xf1e   :  { %v1594_v28 = vpop.eup %1593 }
 0xf1f   :  { %1032 = vrot.lane.b32.xlu0 %v1594_v28, %s1745_s1  ;;  %v1596_v35 = vpop.eup %1595 }
 0xf20   :  { %v1023_v38 = vadd.f32 1.0, %v1596_v35 }
 0xf22   :  { %1597 = vrcp.f32 %v1023_v38 }
 0xf2c   :  { %v1598_v40 = vpop.eup %1597 }
 0xf2d   :  { %v1030_v54 = vmul.f32 %v1598_v40, %v931_v37 }
 0xf91   :  { %v1033_v58 = vpop.permute.xlu0 %1032 }
 0xf92   :  { %v1035_v61 = vmul.f32 %v1598_v40, %v1033_v58 }
 0xf94   :  { %1037 = vrot.lane.b32.xlu1 %v1035_v61, %s1745_s1 }
0x1006   :  { %v1038_v55 = vpop.permute.xlu1 %1037 }
0x1007   :  { %v1040_v62 = vadd.f32 %v1038_v55, %v1030_v54 }
0x1009   :  { %1599 = vtanh.f32 %v1040_v62 }
0x100a   :  { %1601 = vpow2.f32 %v1291_v1 }
0x1013   :  { %v1600_v63 = vpop.eup %1599 }
0x1014   :  { %1043 = vrot.lane.b32.xlu0 %v1600_v63, %s1745_s1  ;;  %v1602_v2 = vpop.eup %1601 }
0x1015   :  { %v1024_v4 = vadd.f32 1.0, %v1602_v2 }
0x1017   :  { %1603 = vrcp.f32 %v1024_v4 }
0x1021   :  { %v1604_v5 = vpop.eup %1603 }
0x1086   :  { %v1044_v6 = vpop.permute.xlu0 %1043 }
0x1087   :  { %v1046_v7 = vmul.f32 %v1604_v5, %v1044_v6 }
0x1089   :  { %1292 = vmatmul.mubr.msk.f32.vlgmr.msra.gmra.mrb[8].mxu0 %vm286_vm4, %v1046_v7 }
0x115c   :  { %v1119_v10 = vpop.f32.mrb[8].mxu0 }
0x115d   :  { %v1124_v48 = vadd.f32 %v1119_v10, %v248_v8  ;;  %v1121_v49 = vpop.f32.mrb[9].mxu0 }
0x115e   :  { %v1125_v11 = vadd.f32 %v1121_v49, %v250_v9 }
0x115f   :  { %v1293_v13 = vmul.f32 -1.442695, %v1124_v48 }
0x1160   :  { %1605 = vtanh.f32 %v1125_v11  ;;  %v1294_v51 = vmul.f32 -1.442695, %v1125_v11 }
0x1161   :  { %1607 = vpow2.f32 %v1293_v13 }
0x116a   :  { %v1606_v12 = vpop.eup %1605 }
0x116b   :  { %1141 = vrot.lane.b32.xlu1 %v1606_v12, %s1745_s1  ;;  %v1608_v14 = vpop.eup %1607 }
0x116c   :  { %v1132_v15 = vadd.f32 1.0, %v1608_v14 }
0x116e   :  { %1609 = vrcp.f32 %v1132_v15 }
0x1178   :  { %v1610_v16 = vpop.eup %1609 }
0x1179   :  { %v1139_v33 = vmul.f32 %v1610_v16, %v1040_v62 }
0x11dd   :  { %v1142_v18 = vpop.permute.xlu1 %1141 }
0x11de   :  { %v1144_v20 = vmul.f32 %v1610_v16, %v1142_v18 }
0x11e0   :  { %1146 = vrot.lane.b32.xlu0 %v1144_v20, %s1745_s1 }
0x1252   :  { %v1147_v17 = vpop.permute.xlu0 %1146 }
0x1253   :  { %v1149_v34 = vadd.f32 %v1147_v17, %v1139_v33 }
0x1255   :  { %1611 = vtanh.f32 %v1149_v34 }
0x1256   :  { %1613 = vpow2.f32 %v1294_v51 }
0x125f   :  { %v1612_v36 = vpop.eup %1611 }
0x1260   :  { %1152 = vrot.lane.b32.xlu1 %v1612_v36, %s1745_s1  ;;  %v1614_v52 = vpop.eup %1613 }
0x1261   :  { %v1133_v37 = vadd.f32 1.0, %v1614_v52 }
0x1263   :  { %1615 = vrcp.f32 %v1133_v37 }
0x126d   :  { %v1616_v39 = vpop.eup %1615 }
0x12d2   :  { %v1153_v46 = vpop.permute.xlu1 %1152 }
0x12d3   :  { %v1155_v47 = vmul.f32 %v1616_v39, %v1153_v46 }
0x12d5   :  { %1323 = vmatmul.mubr.msk.f32.vlgmr.msra.gmra.mrb[16].mxu1 %vm286_vm4, %v1155_v47 }
0x13a8   :  { %v1240_v0 = vpop.f32.mrb[16].mxu1 }
0x13a9   :  { %v1241_v42 = vadd.f32 %v1295_v41, %v1240_v0  ;;  %v1324_v43 = vpop.f32.mrb[17].mxu1 }
0x13ab   :  { %1244 = vst [vmem:[#allocation11] sm:$0xff] %v1241_v42 }
0x13ac   :  { %1716 = shalt.err (!%p1713_p8)
}
0x13ad   :  { %s1717_s29 = scalar_lea.hbm %s2071_s6, 128 }
0x13ae   :  { %p1718_p9 = scmp.ne.s32.totalorder %s2071_s6, %s1717_s29  ;;  %p1721_p10 = scmp.lt.u32.totalorder %s1717_s29, %s2071_s6 }
0x13b0   :  { %p1723_p11 = pnand %p1721_p10, %p1718_p9 }
0x13b2   :  { %1726 = shalt.err (!%p1723_p11)
}
0x13b3   :  { %1254 = dma.vmem_to_hbm [thread:$0]  %s1252_s25, 128, %s2071_s6, [#allocation5]  }
0x13b4   :  { %1733 = dma.done.wait [#allocation5], 128  }
0x13b5   :  { %1734 = vsyncadd [#allocation5], 4294967168 }
0x13b6   :  { %1258 = vsyncpa [#allocation4], 1 }
0x13b7   :  { %1259 = vsyncpa [#allocation7], 1 }
0x13b8   :  { %1260 = vsyncpa [#allocation10], 1 }
0x13b9   :  { %1261 = vsyncpa [#allocation5], 1 }

</bundles_post_ra>
